<compile_context>
chip_gen: v6e
topology: v6e:2x2x1
jax: 0.10.0
libtpu: 0.0.40
codegen_flags: <defaults>
</compile_context>

<pallas_src>
import functools

import jax
import jax.numpy as jnp
from jax.experimental import pallas as pl
from jax.experimental.pallas import tpu as pltpu

_LANE = 128
_ACC_ROWS = 8  # full sublane tile; rows 0..4 are live, 5..7 are padding


def _seg_loss_kernel(
    pred_ref,
    y_ref,
    out_ref,
    acc_ref,
    *,
    n,
    block_rows,
    steps,
    alpha,
    gamma,
    need_focal,
    need_dice,
):
    """Accumulates the reductions needed by the loss into acc_ref rows.

    acc rows:
      0: sum(bce_with_logits(pred, target))
      1: sum(alpha * (1 - pt)**gamma * bce)   (focal, un-averaged)  [if enabled]
      2: sum(sigmoid(pred) * target)                                 [if dice]
      3: sum(sigmoid(pred)**2)                                       [if dice]
      4: sum(target**2)                                              [if dice]
    """
    s = pl.program_id(0)  # parallel slice (megacore on v7x)
    i = pl.program_id(1)  # reduction step along the point stream

    @pl.when(i == 0)
    def _init():
        acc_ref[...] = jnp.zeros_like(acc_ref)

    x = pred_ref[...].astype(jnp.float32)  # (block_rows, 128) logits
    y = y_ref[...]                         # (block_rows, 128) raw labels

    # In-kernel validity mask for the padded tail (no HBM mask stream).
    row = jax.lax.broadcasted_iota(jnp.int32, x.shape, 0)
    lane = jax.lax.broadcasted_iota(jnp.int32, x.shape, 1)
    base_row = (s * steps + i) * block_rows
    flat_idx = (base_row + row) * _LANE + lane
    mask = flat_idx < n

    # target = (y >= 0).float(), zeroed on padding.
    t = jnp.where(mask & (y >= 0.0), 1.0, 0.0).astype(jnp.float32)

    # Shared transcendental: e = exp(-|x|).
    e = jnp.exp(-jnp.abs(x))

    # Numerically-stable BCE-with-logits (same formula torch uses):
    #   max(x, 0) - x*t + log(1 + exp(-|x|))
    bce = jnp.maximum(x, 0.0) - x * t + jnp.log1p(e)
    bce = jnp.where(mask, bce, 0.0)
    acc_ref[0:1, :] += jnp.sum(bce, axis=0, keepdims=True)

    if need_focal or need_dice:
        # sigmoid(x) from the shared e: 1/(1+e) if x>=0 else e/(1+e).
        inv = pl.reciprocal(1.0 + e, approx=True)
        probs = jnp.where(x >= 0.0, inv, e * inv)
        probs = jnp.where(mask, probs, 0.0)

    if need_focal:
        # pt = exp(-bce) == probs^t * (1-probs)^(1-t); for binary t this is
        # exactly probs*t + (1-probs)*(1-t)  -> avoids a second exp.
        pt = probs * t + (1.0 - probs) * (1.0 - t)
        one_minus_pt = jnp.maximum(1.0 - pt, 0.0)  # clamp guards pow/rounding
        if float(gamma) == 2.0:
            pow_term = one_minus_pt * one_minus_pt
        else:
            pow_term = one_minus_pt ** gamma
        focal = alpha * pow_term * bce  # bce already zeroed on padding
        acc_ref[1:2, :] += jnp.sum(focal, axis=0, keepdims=True)

    if need_dice:
        acc_ref[2:3, :] += jnp.sum(probs * t, axis=0, keepdims=True)
        acc_ref[3:4, :] += jnp.sum(probs * probs, axis=0, keepdims=True)
        # target is {0,1} so target**2 == target.
        acc_ref[4:5, :] += jnp.sum(t, axis=0, keepdims=True)

    @pl.when(i == pl.num_programs(1) - 1)
    def _finalize():
        out_ref[0] = acc_ref[...]


def binary_segmentation_loss(
    x_feat,
    y_feat,
    *,
    bce_weight: float = 1.0,
    dice_weight: float = 0.0,
    focal_weight: float = 0.0,
    focal_alpha: float = 0.25,
    focal_gamma: float = 2.0,
    block_rows: int = 1024,
    num_slices: int = 2,
):
    """JAX/Pallas equivalent of BinarySegmentationLoss.forward.

    x_feat: (N, C) float — point features of prediction PointTensor (x.F)
    y_feat: (N,)  float — labels of target PointTensor (y.F); target = (y >= 0)
    """
    need_focal = bool(focal_weight)
    need_dice = bool(dice_weight)

    # TODO(synk): x_feat[:, 0] makes XLA stream the full (N, C) array before
    # the kernel; store pred contiguously upstream to avoid the C-x read.
    pred = x_feat[:, 0].astype(jnp.float32)
    y = y_feat.astype(jnp.float32)

    n = pred.shape[0]

    # Pick an effective block size: big for large N, clamped for small N.
    rows_needed = -(-n // _LANE)
    rows_per_slice = max(8, -(-rows_needed // num_slices))
    block_rows_eff = min(block_rows, ((rows_per_slice + 7) // 8) * 8)

    tile = num_slices * block_rows_eff * _LANE
    n_pad = ((n + tile - 1) // tile) * tile
    pad = n_pad - n
    total_rows = n_pad // _LANE
    steps = total_rows // (num_slices * block_rows_eff)

    pred_p = jnp.pad(pred, (0, pad)).reshape(total_rows, _LANE)
    y_p = jnp.pad(y, (0, pad), constant_values=-1.0).reshape(total_rows, _LANE)

    in_spec = pl.BlockSpec(
        (block_rows_eff, _LANE), lambda s, i: (s * steps + i, 0)
    )

    kernel = functools.partial(
        _seg_loss_kernel,
        n=n,
        block_rows=block_rows_eff,
        steps=steps,
        alpha=focal_alpha,
        gamma=focal_gamma,
        need_focal=need_focal,
        need_dice=need_dice,
    )

    sums = pl.pallas_call(
        kernel,
        out_shape=jax.ShapeDtypeStruct((num_slices, _ACC_ROWS, _LANE), jnp.float32),
        grid_spec=pltpu.PrefetchScalarGridSpec(
            num_scalar_prefetch=0,
            grid=(num_slices, steps),
            in_specs=[in_spec, in_spec],
            out_specs=pl.BlockSpec(
                (1, _ACC_ROWS, _LANE), lambda s, i: (s, 0, 0)
            ),
            scratch_shapes=[pltpu.VMEM((_ACC_ROWS, _LANE), jnp.float32)],
        ),
        compiler_params=pltpu.CompilerParams(
            dimension_semantics=("parallel", "arbitrary"),
        ),
    )(pred_p, y_p)

    # Tiny final reduction + scalar combination: plain JAX glue.
    s_vec = jnp.sum(sums, axis=(0, 2))  # (_ACC_ROWS,)
    n_f = jnp.float32(n)

    loss = bce_weight * (s_vec[0] / n_f)  # BCEWithLogitsLoss default 'mean'

    if need_dice:
        # TODO(synk): torch.sum(probs, dim=()) on a 1-D tensor is the
        # degenerate dim=() case; implemented as a full reduction
        # (single-sample dice), matching the original translation.
        numerator = 2.0 * s_vec[2]
        denominator = s_vec[3] + s_vec[4]
        dice_loss = 1.0 - (numerator + 1.0) / (denominator + 1.0)
        loss = loss + dice_weight * dice_loss

    if need_focal:
        loss = loss + focal_weight * (s_vec[1] / n_f)

    return loss


def _reference_loss(
    x_feat,
    y_feat,
    *,
    bce_weight=1.0,
    dice_weight=0.0,
    focal_weight=0.0,
    focal_alpha=0.25,
    focal_gamma=2.0,
):
    """Pure-JAX reference mirroring the PyTorch module."""
    pred = x_feat[:, 0].astype(jnp.float32)
    target = (y_feat >= 0).astype(jnp.float32)
    bce = jnp.maximum(pred, 0.0) - pred * target + jnp.log1p(jnp.exp(-jnp.abs(pred)))
    loss = bce_weight * jnp.mean(bce)
    if dice_weight:
        probs = jax.nn.sigmoid(pred)
        numerator = 2.0 * jnp.sum(probs * target)
        denominator = jnp.sum(probs ** 2) + jnp.sum(target ** 2)
        dice_loss = 1.0 - (numerator + 1.0) / (denominator + 1.0)
        loss = loss + dice_weight * dice_loss
    if focal_weight:
        pt = jnp.exp(-bce)
        focal = focal_alpha * (1.0 - pt) ** focal_gamma * bce
        loss = loss + focal_weight * jnp.mean(focal)
    return loss


if __name__ == "__main__":
    key = jax.random.PRNGKey(0)
    k1, k2 = jax.random.split(key)

    N, C = 2048, 4
    x_feat = jax.random.normal(k1, (N, C), dtype=jnp.float32)   # x.F
    y_feat = jax.random.normal(k2, (N,), dtype=jnp.float32)     # y.F (labels; >=0 -> fg)

    # Default module configuration: bce_weight=1.0, dice_weight=0.0, focal_weight=0.0
    loss_default = binary_segmentation_loss(x_feat, y_feat)
    jax.block_until_ready(loss_default)

    # Also exercise the dice + focal paths of the kernel.
    loss_full = binary_segmentation_loss(
        x_feat, y_feat, bce_weight=1.0, dice_weight=0.5, focal_weight=0.5
    )
    jax.block_until_ready(loss_full)

    # Sanity check against a pure-JAX reference (loose tolerance: the kernel
    # uses the EUP approx-reciprocal path for sigmoid in dice/focal).
    ref_default = _reference_loss(x_feat, y_feat)
    ref_full = _reference_loss(
        x_feat, y_feat, bce_weight=1.0, dice_weight=0.5, focal_weight=0.5
    )
    assert jnp.allclose(loss_default, ref_default, rtol=5e-3, atol=5e-3), (
        loss_default, ref_default)
    assert jnp.allclose(loss_full, ref_full, rtol=5e-3, atol=5e-3), (
        loss_full, ref_full)

    print("KERNEL_OK")
</pallas_src>

<mosaic_0001>
module attributes {stable_mosaic.version = 11 : i64} {
  func.func @_seg_loss_kernel(%arg0: i32, %arg1: i32, %arg2: memref<8x128xf32, #tpu.memory_space<vmem>>, %arg3: memref<8x128xf32, #tpu.memory_space<vmem>>, %arg4: memref<1x8x128xf32, #tpu.memory_space<vmem>>, %arg5: memref<8x128xf32, #tpu.memory_space<vmem>>) attributes {dimension_semantics = [#tpu.dimension_semantics<parallel>, #tpu.dimension_semantics<arbitrary>], iteration_bounds = array<i64: 2, 1>, scalar_prefetch = 0 : i64, scratch_operands = 1 : i64, tpu.core_type = #tpu.core_type<tc>, window_params = [{transform_indices = @transform_0, window_bounds = array<i64: 8, 128>}, {transform_indices = @transform_1, window_bounds = array<i64: 8, 128>}, {transform_indices = @transform_2, window_bounds = array<i64: 1, 8, 128>}]} {
    %c0_i32 = arith.constant 0 : i32
    %0 = arith.cmpi eq, %arg1, %c0_i32 : i32
    %1 = arith.extui %0 : i1 to i32
    %c0_i32_0 = arith.constant 0 : i32
    %2 = arith.cmpi ne, %1, %c0_i32_0 : i32
    scf.if %2 {
      %cst_16 = arith.constant 0.000000e+00 : f32
      %43 = vector.broadcast %cst_16 : f32 to vector<8x128xf32>
      %c0_17 = arith.constant 0 : index
      %c0_18 = arith.constant 0 : index
      %44 = vector.load %arg5[%c0_17, %c0_18] : memref<8x128xf32, #tpu.memory_space<vmem>>, vector<8x128xf32>
      tpu.vector_store %arg5[%c0_17, %c0_18], %43 {strides = array<i32>} : memref<8x128xf32, #tpu.memory_space<vmem>>, vector<8x128xf32>,
    } else {
    }
    %c0 = arith.constant 0 : index
    %c0_1 = arith.constant 0 : index
    %3 = vector.load %arg2[%c0, %c0_1] : memref<8x128xf32, #tpu.memory_space<vmem>>, vector<8x128xf32>
    %c0_2 = arith.constant 0 : index
    %c0_3 = arith.constant 0 : index
    %4 = vector.load %arg3[%c0_2, %c0_3] : memref<8x128xf32, #tpu.memory_space<vmem>>, vector<8x128xf32>
    %5 = tpu.iota {dimensions = array<i32: 0>} : vector<8x128xi32>
    %6 = tpu.iota {dimensions = array<i32: 1>} : vector<8x128xi32>
    %c1_i32 = arith.constant 1 : i32
    %7 = arith.muli %arg0, %c1_i32 : i32
    %8 = arith.addi %7, %arg1 : i32
    %c8_i32 = arith.constant 8 : i32
    %9 = arith.muli %8, %c8_i32 : i32
    %10 = vector.broadcast %9 : i32 to vector<8x128xi32>
    %11 = arith.addi %10, %5 : vector<8x128xi32>
    %c128_i32 = arith.constant 128 : i32
    %12 = vector.broadcast %c128_i32 : i32 to vector<8x128xi32>
    %13 = arith.muli %11, %12 : vector<8x128xi32>
    %14 = arith.addi %13, %6 : vector<8x128xi32>
    %c2048_i32 = arith.constant 2048 : i32
    %15 = vector.broadcast %c2048_i32 : i32 to vector<8x128xi32>
    %16 = arith.cmpi slt, %14, %15 : vector<8x128xi32>
    %cst = arith.constant 0.000000e+00 : f32
    %17 = vector.broadcast %cst : f32 to vector<8x128xf32>
    %18 = arith.cmpf oge, %4, %17 : vector<8x128xf32>
    %19 = arith.andi %16, %18 : vector<8x128xi1>
    %cst_4 = arith.constant 1.000000e+00 : f32
    %cst_5 = arith.constant 0.000000e+00 : f32
    %20 = vector.broadcast %cst_4 : f32 to vector<8x128xf32>
    %21 = vector.broadcast %cst_5 : f32 to vector<8x128xf32>
    %22 = arith.select %19, %20, %21 : vector<8x128xi1>, vector<8x128xf32>
    %23 = math.absf %3 : vector<8x128xf32>
    %cst_6 = arith.constant 0.000000e+00 : f32
    %24 = vector.broadcast %cst_6 : f32 to vector<8x128xf32>
    %25 = arith.subf %24, %23 : vector<8x128xf32>
    %26 = math.exp %25 : vector<8x128xf32>
    %cst_7 = arith.constant 0.000000e+00 : f32
    %27 = vector.broadcast %cst_7 : f32 to vector<8x128xf32>
    %28 = arith.maximumf %3, %27 : vector<8x128xf32>
    %29 = arith.mulf %3, %22 : vector<8x128xf32>
    %30 = arith.subf %28, %29 : vector<8x128xf32>
    %31 = math.log1p %26 : vector<8x128xf32>
    %32 = arith.addf %30, %31 : vector<8x128xf32>
    %cst_8 = arith.constant 0.000000e+00 : f32
    %33 = vector.broadcast %cst_8 : f32 to vector<8x128xf32>
    %34 = arith.select %16, %32, %33 : vector<8x128xi1>, vector<8x128xf32>
    %c0_9 = arith.constant 0 : index
    %c0_10 = arith.constant 0 : index
    %35 = vector.load %arg5[%c0_9, %c0_10] : memref<8x128xf32, #tpu.memory_space<vmem>>, vector<1x128xf32>
    %cst_11 = arith.constant dense<0.000000e+00> : vector<128xf32>
    %36 = vector.multi_reduction <add>, %34, %cst_11 [0] : vector<8x128xf32> to vector<128xf32>
    %37 = vector.shape_cast %36 : vector<128xf32> to vector<1x128xf32>
    %38 = arith.addf %35, %37 : vector<1x128xf32>
    %c0_12 = arith.constant 0 : index
    %c0_13 = arith.constant 0 : index
    %39 = vector.load %arg5[%c0_12, %c0_13] : memref<8x128xf32, #tpu.memory_space<vmem>>, vector<1x128xf32>
    tpu.vector_store %arg5[%c0_12, %c0_13], %38 {strides = array<i32>} : memref<8x128xf32, #tpu.memory_space<vmem>>, vector<1x128xf32>,
    %c0_i32_14 = arith.constant 0 : i32
    %40 = arith.cmpi eq, %arg1, %c0_i32_14 : i32
    %41 = arith.extui %40 : i1 to i32
    %c0_i32_15 = arith.constant 0 : i32
    %42 = arith.cmpi ne, %41, %c0_i32_15 : i32
    scf.if %42 {
      %c0_16 = arith.constant 0 : index
      %c0_17 = arith.constant 0 : index
      %43 = vector.load %arg5[%c0_16, %c0_17] : memref<8x128xf32, #tpu.memory_space<vmem>>, vector<8x128xf32>
      %c0_18 = arith.constant 0 : index
      %c0_19 = arith.constant 0 : index
      %c0_20 = arith.constant 0 : index
      %44 = vector.load %arg4[%c0_18, %c0_19, %c0_20] : memref<1x8x128xf32, #tpu.memory_space<vmem>>, vector<1x8x128xf32>
      %45 = vector.shape_cast %44 : vector<1x8x128xf32> to vector<8x128xf32>
      %46 = vector.shape_cast %43 : vector<8x128xf32> to vector<1x8x128xf32>
      tpu.vector_store %arg4[%c0_18, %c0_19, %c0_20], %46 {strides = array<i32>} : memref<1x8x128xf32, #tpu.memory_space<vmem>>, vector<1x8x128xf32>,
    } else {
    }
    return
  }
  func.func @transform_0(%arg0: i32, %arg1: i32) -> (i32, i32) {
    %c1_i32 = arith.constant 1 : i32
    %0 = arith.muli %arg0, %c1_i32 : i32
    %1 = arith.addi %0, %arg1 : i32
    %c0_i32 = arith.constant 0 : i32
    %c0_i32_0 = arith.constant 0 : i32
    return %1, %c0_i32 : i32, i32
  }
  func.func @transform_1(%arg0: i32, %arg1: i32) -> (i32, i32) {
    %c1_i32 = arith.constant 1 : i32
    %0 = arith.muli %arg0, %c1_i32 : i32
    %1 = arith.addi %0, %arg1 : i32
    %c0_i32 = arith.constant 0 : i32
    %c0_i32_0 = arith.constant 0 : i32
    return %1, %c0_i32 : i32, i32
  }
  func.func @transform_2(%arg0: i32, %arg1: i32) -> (i32, i32, i32) {
    %c0_i32 = arith.constant 0 : i32
    %c0_i32_0 = arith.constant 0 : i32
    %c0_i32_1 = arith.constant 0 : i32
    return %arg0, %c0_i32, %c0_i32_0 : i32, i32, i32
  }
}

</mosaic_0001>

<bundles_post_ra>
// kernel: tpu_custom_call.1
= control target key start
LH: loop header
LB: loop body
LE: loop exit
PB: predicated region body
PF: predicated region fallthrough
CT: control target
= control target key end

     0   :  { %7 = vsyncpa [#allocation4], 0  ;;  %s811_s0 = inlined_call_operand.hbm [shape: f32[16,128], index: 0, kind: input, shape index: {}]   ;;  %s812_s1 = inlined_call_operand.hbm [shape: f32[16,128], index: 1, kind: input, shape index: {}]   ;;  %s813_s2 = inlined_call_operand.hbm [shape: f32[2,8,128], index: 2, kind: output, shape index: {}]  }
   0x1   :  { %9 = vsyncpa [#allocation4 + $0x1], 0 }
   0x2   :  { %10 = vsyncpa [#allocation7], 0 }
   0x3   :  { %12 = vsyncpa [#allocation7 + $0x1], 0 }
   0x4   :  { %13 = vsyncpa [#allocation5], 0 }
   0x5   :  { %15 = vsyncpa [#allocation5 + $0x1], 0  ;;  %s636_s9 = smov 0   ;;  %s638_s10 = smov 0  }
   0x6   :  { %s640_s11 = smov 0   ;;  %s642_s12 = smov 0  }
   0x7   :  { %s644_s13 = smov 0   ;;  %s646_s14 = smov 0  }
   0x8 LB: > { %s386_s15 = sadd.s32 4294967295, %s615_s14   ;;  %s387_s16 = sadd.s32 4294967294, %s615_s14   ;;  %s615_s14 = sphi %s646_s14, %s21_s14   ;;  %s611_s13 = sphi %s644_s13, %s825_s13   ;;  %s607_s12 = sphi %s642_s12, %s824_s12   ;;  %s603_s11 = sphi %s640_s11, %s823_s11   ;;  %s599_s10 = sphi %s638_s10, %s822_s10   ;;  %s595_s9 = sphi %s636_s9, %s821_s9  }
   0x9   : > { %s33_s17 = sadd.s32 1, %s611_s13  ;;  %s42_s18 = sadd.s32 1, %s603_s11 }
   0xa   : > { %p35_p0 = scmp.ge.s32.totalorder %s33_s17, 2  ;;  %p49_p1 = scmp.ne.s32.totalorder %s603_s11, %s599_s10 }
   0xb   : > { %p50_p2 = scmp.eq.s32.totalorder %s615_s14, 0  ;;  %p55_p3 = scmp.ne.s32.totalorder %s599_s10, %s595_s9 }
   0xc   : > { %s827_s17 = smov (%p35_p0, %s33_s17), 0  ;;  %p56_p5 = scmp.eq.s32.totalorder %s386_s15, 0 }
   0xd   : > { %p677_p4 = por %p50_p2, %p49_p1  ;;  %s39_s20 = ssub.s32 %s611_s13, %s827_s17 }
   0xe   : > { %p107_p6 = scmp.eq.s32.totalorder %s386_s15, 1  ;;  %p40_p7 = scmp.eq.s32.totalorder %s39_s20, 0 }
   0xf   : > { %p683_p8 = por %p56_p5, %p55_p3  ;;  %p113_p10 = scmp.eq.s32.totalorder %s387_s16, 1 }
  0x10   : > { %p687_p9 = por %p107_p6, %p49_p1  ;;  %p420_p13 = scmp.lt.s32.totalorder %s615_s14, 2 }
  0x11   : > { %s692_s23 = scalar_select %p40_p7, %s603_s11, %s42_s18  }
  0x12   : > { %p694_p11 = por %p113_p10, %p55_p3  ;;  %s701_s25 = sand.u32 1, %s603_s11  }
  0x13   : > { %s390_s26 = sshll.u32 %s701_s25, 3  ;;  %s391_s27 = sshll.u32 %s611_s13, 7 }
  0x14   : > { %s143_s30 = scalar_lea.hbm %s811_s0, %s391_s27  ;;  %s137_s3 = scalar_lea.vmem [#allocation3], %s390_s26 }
  0x15   : > { %s145_s4 = sshll.u32 %s137_s3, 4  ;;  %p710_p0 = pnand %p420_p13, %p677_p4  ;;  %s146_s4 = int_to_ptr.vmem [resolvable:$true] %s145_s4 }
  0x16   : > { %p394_p1 = scmp.ge.s32.totalorder %s615_s14, 1  ;;  %p169_p2 = scmp.lt.s32.totalorder %s615_s14, 3 }
  0x17   : > { %s134_s6 = scalar_lea.sflag [#allocation4], %s701_s25  ;;  %p477_p3 = pneg %p710_p0 }
  0x18   : > { %s488_s7 = scalar_lea.vmem %s146_s4, 128  ;;  %s617_s8 = smov [#allocation3]  }
  0x19   : > { %p489_p5 = scmp.ne.s32.totalorder %s146_s4, %s488_s7  ;;  %s493_s15 = sshll.u32 %s617_s8, 4  ;;  %s494_s15 = int_to_ptr.vmem [resolvable:$false] %s493_s15 }
  0x1a   : > { %s495_s16 = scalar_lea.vmem %s494_s15, 256  ;;  %p496_p4 = scmp.lt.s32.totalorder %s146_s4, %s494_s15 }
  0x1b   : > { %p491_p6 = pnand %p489_p5, %p477_p3  ;;  %p497_p10 = scmp.lt.s32.totalorder %s495_s16, %s488_s7 }
  0x1d   : > { %p492_p7 = pneg %p491_p6  ;;  %p498_p13 = por %p497_p10, %p496_p4 }
  0x1f   : > { %p499_p12 = pnand %p498_p13, %p492_p7 }
  0x21   : > { %502 = shalt.err (!%p499_p12)
}
  0x22   : > { %412 = dma.hbm_to_vmem [thread:$0]  (!%p710_p0), %s143_s30, 128, %s146_s4, %s134_s6  }
  0x23   : > { %p728_p5 = pnand %p394_p1, %p169_p2  ;;  %s162_s28 = scalar_lea.hbm %s812_s1, %s391_s27 }
  0x24   : > { %s156_s29 = scalar_lea.vmem [#allocation6], %s390_s26  ;;  %s153_s7 = scalar_lea.sflag [#allocation7], %s701_s25 }
  0x25   : > { %s164_s3 = sshll.u32 %s156_s29, 4  ;;  %s618_s30 = smov [#allocation6]   ;;  %s165_s3 = int_to_ptr.vmem [resolvable:$true] %s164_s3 }
  0x26   : > { %s516_s8 = scalar_lea.vmem %s165_s3, 128  ;;  %s521_s4 = sshll.u32 %s618_s30, 4  ;;  %s522_s4 = int_to_ptr.vmem [resolvable:$false] %s521_s4 }
  0x27   : > { %p517_p12 = scmp.ne.s32.totalorder %s165_s3, %s516_s8  ;;  %s523_s6 = scalar_lea.vmem %s522_s4, 256 }
  0x28   : > { %p524_p1 = scmp.lt.s32.totalorder %s165_s3, %s522_s4  ;;  %p525_p2 = scmp.lt.s32.totalorder %s523_s6, %s516_s8 }
  0x29   : > { %p519_p6 = pnand %p517_p12, %p477_p3 }
  0x2a   : > { %p526_p4 = por %p525_p2, %p524_p1 }
  0x2b   : > { %p520_p7 = pneg %p519_p6 }
  0x2d   : > { %p527_p10 = pnand %p526_p4, %p520_p7 }
  0x2f   : > { %530 = shalt.err (!%p527_p10)
}
  0x30   : > { %415 = dma.hbm_to_vmem [thread:$0]  (!%p710_p0), %s162_s28, 128, %s165_s3, %s153_s7  }
  0x31   : > { %173 = sbr.rel (%p728_p5) target bundleno = 135 (0x87), region = 28  ;;  %s744_s25 = sand.u32 (!%p728_p5), 1, %s599_s10  }
  0x32   : > { %s747_s26 = sshll.u32 (!%p728_p5), %s744_s25, 3  ;;  %s176_s27 = scalar_lea.sflag (!%p728_p5), [#allocation4], %s744_s25 }
  0x33   : > { %s179_s15 = scalar_lea.vmem (!%p728_p5), [#allocation3], %s747_s26 }
  0x36   : > { %582 = dma.done.wait (%p683_p8), %s176_s27, 128  }
  0x37   : > { %584 = vsyncadd (%p683_p8), %s176_s27, 4294967168  ;;  %s185_s5 = scalar_lea.sflag [#allocation7], %s744_s25  ;;  %s188_s16 = scalar_lea.vmem [#allocation6], %s747_s26 }
  0x38   : > { %586 = dma.done.wait (%p683_p8), %s185_s5, 128  }
  0x39   : > { %588 = vsyncadd (%p683_p8), %s185_s5, 4294967168  ;;  %v619_v0 = vmov 0.0   ;;  %v221_v1 = vld [vmem:[%s179_s15] sm:$0xff]  ;;  %v223_v3 = vlaneseq  ;;  %s398_s18 = sshll.u32 %s607_s12, 3  ;;  %v222_v13 = vld [vmem:[%s188_s16] sm:$0xff]  ;;  %s213_s21 = scalar_lea.vmem [#allocation8], %s747_s26 }
  0x3a   : > { %220 = vst [vmem:[#allocation2] sm:$0xff] %v619_v0  ;;  %v237_v2 = vand.u32 2147483647, %v221_v1  ;;  %v229_v7 = vstv %s398_s18  ;;  %vm234_vm1 = vcmp.ge.f32.partialorder %v222_v13, 0.0  ;;  %v241_v18 = vmax.f32 %v221_v1, 0.0  ;;  %s283_s19 = sshll.u32 %s213_s21, 4  ;;  %s766_s19 = int_to_ptr.vmem [resolvable:$true] %s283_s19 }
  0x3b   : > { %v224_v6 = vshrl.u32 %v223_v3, 7  ;;  %v226_v9 = vand.u32 127, %v223_v3  ;;  %s400_s20 = sshll.u32 %s607_s12, 7  ;;  %s270_s7 = scalar_lea.sflag [#allocation5], %s744_s25 }
  0x3c   : > { %v238_v4 = vsub.f32 0.0, %v237_v2  ;;  %s281_s3 = scalar_lea.hbm %s813_s2, %s400_s20  ;;  %s531_s8 = scalar_lea.vmem %s766_s19, 128 }
  0x3d   : > { %v230_v8 = vadd.s32 %v229_v7, %v224_v6  ;;  %p532_p8 = scmp.ne.s32.totalorder %s766_s19, %s531_s8  ;;  %s620_s30 = smov [#allocation8]  }
  0x3e   : > { %v239_v5 = vmul.f32 1.442695, %v238_v4  ;;  %s535_s4 = sshll.u32 %s620_s30, 4  ;;  %s536_s4 = int_to_ptr.vmem [resolvable:$false] %s535_s4 }
  0x3f   : > { %v231_v10 = vmul.u32 128, %v230_v8  ;;  %p533_p0 = pnand %p532_p8, %p687_p9  ;;  %s537_s12 = scalar_lea.vmem %s536_s4, 256 }
  0x40   : > { %471 = vpow2.f32 %v239_v5  ;;  %p538_p13 = scmp.lt.s32.totalorder %s766_s19, %s536_s4  ;;  %p539_p5 = scmp.lt.s32.totalorder %s537_s12, %s531_s8 }
  0x41   : > { %v232_v11 = vadd.s32 %v231_v10, %v226_v9  ;;  %v255_v33 = vld [vmem:[#allocation2] sm:$0x1]  ;;  %p534_p3 = pneg %p533_p0 }
  0x42   : > { %p540_p12 = por %p539_p5, %p538_p13 }
  0x43   : > { %vm233_vm0 = vcmp.lt.s32.totalorder %v232_v11, 2048 }
  0x44   : > { %vm235_vm2 = vmand %vm233_vm0, %vm234_vm1  ;;  %p541_p6 = pnand %p540_p12, %p534_p3 }
  0x45   : > { %v236_v16 = vsel %vm235_vm2, 1.0, %v619_v0 }
  0x46   : > { %v242_v19 = vmul.f32 %v236_v16, %v221_v1 }
  0x48   : > { %v243_v23 = vsub.f32 %v241_v18, %v242_v19 }
  0x4d   : > { %v472_v12 = vpop.eup %471 }
  0x4e   : > { %v244_v14 = vadd.f32 1.0, %v472_v12  ;;  %v247_v15 = vmul.f32 -0.5, %v472_v12  ;;  %v250_v20 = vand.u32 2147483647, %v472_v12 }
  0x50   : > { %473 = vlog2.f32 %v244_v14  ;;  %v248_v17 = vadd.f32 1.0, %v247_v15  ;;  %vm251_vm3 = vcmp.lt.f32.partialorder %v250_v20, 0.0004427343 }
  0x52   : > { %v249_v21 = vmul.f32 %v472_v12, %v248_v17 }
  0x5d   : > { %v474_v22 = vpop.eup %473 }
  0x5e   : > { %v246_v24 = vmul.f32 0.6931472, %v474_v22 }
  0x60   : > { %v252_v25 = vsel %vm251_vm3, %v249_v21, %v246_v24 }
  0x61   : > { %v253_v26 = vadd.f32 %v252_v25, %v243_v23 }
  0x63   : > { %v254_v27 = vsel %vm233_vm0, %v253_v26, 0.0 }
  0x64   : > { %v256_v28 = vrot.slane %v254_v27, 4 }
  0x66   : > { %v257_v29 = vadd.f32 %v256_v28, %v254_v27 }
  0x68   : > { %v258_v30 = vrot.slane %v257_v29, 2 }
  0x6a   : > { %v259_v31 = vadd.f32 %v258_v30, %v257_v29 }
  0x6c   : > { %v260_v32 = vrot.slane %v259_v31, 1 }
  0x6e   : > { %v261_v34 = vadd.f32 %v260_v32, %v259_v31 }
  0x70   : > { %v262_v35 = vadd.f32 %v261_v34, %v255_v33 }
  0x72   : > { %263 = vst [vmem:[#allocation2] sm:$0x1] %v262_v35 }
  0x79   : > { %v267_v36 = vld [vmem:[#allocation2] sm:$0xff] }
  0x7a   : > { %268 = vst [vmem:[%s213_s21] sm:$0xff] %v267_v36 }
  0x7b   : > { %544 = shalt.err (!%p541_p6)
}
  0x7c   : > { %s545_s6 = scalar_lea.hbm %s281_s3, 128  ;;  %s549_s27 = scalar_lea.hbm %s813_s2, 256 }
  0x7d   : > { %p546_p7 = scmp.ne.s32.totalorder %s281_s3, %s545_s6  ;;  %p550_p4 = scmp.lt.s32.totalorder %s281_s3, %s813_s2 }
  0x7e   : > { %p551_p10 = scmp.lt.s32.totalorder %s549_s27, %s545_s6 }
  0x7f   : > { %p547_p1 = pnand %p546_p7, %p687_p9 }
  0x80   : > { %p552_p8 = por %p551_p10, %p550_p4 }
  0x81   : > { %p548_p2 = pneg %p547_p1 }
  0x83   : > { %p553_p0 = pnand %p552_p8, %p548_p2 }
  0x85   : > { %556 = shalt.err (!%p553_p0)
}
  0x86   : > { %407 = dma.vmem_to_hbm [thread:$0]  (%p687_p9), %s766_s19, 128, %s281_s3, %s270_s7  }
  0x87 PF: > { %s295_s16 = sand.u32 1, %s595_s9   ;;  %p820_p3 = scmp.ge.s32.totalorder %s615_s14, 2 }
  0x88   : > { %s296_s18 = scalar_lea.sflag [#allocation5], %s295_s16 }
  0x89   : > { %p417_p13 = pnand %p820_p3, %p694_p11 }
  0x8b   : > { %p418_p5 = pneg %p417_p13 }
  0x8d   : > { %590 = dma.done.wait (%p418_p5), %s296_s18, 128  }
  0x8e   : > { %592 = vsyncadd (%p418_p5), %s296_s18, 4294967168  ;;  %s21_s14 = sadd.s32 1, %s615_s14   ;;  %s821_s9 = smov %s599_s10 }
  0x8f   : > { %p18_p12 = scmp.ge.s32.totalorder %s21_s14, 4   ;;  %s822_s10 = smov %s603_s11 }
  0x90   : > { %s823_s11 = smov %s692_s23  ;;  %s824_s12 = smov %s611_s13 }
  0x91   : > { %s825_s13 = smov %s827_s17  ;;  %20 = sbr.rel (!%p18_p12) target bundleno = 8 (0x8), region = 94 }
  0x96   :  { %301 = vsyncpa [#allocation4], 1 }
  0x97   :  { %303 = vsyncpa [#allocation4 + $0x1], 1 }
  0x98   :  { %304 = vsyncpa [#allocation7], 1 }
  0x99   :  { %306 = vsyncpa [#allocation7 + $0x1], 1 }
  0x9a   :  { %307 = vsyncpa [#allocation5], 1 }
  0x9b   :  { %309 = vsyncpa [#allocation5 + $0x1], 1 }

</bundles_post_ra>
